<compile_context>
chip_gen: v7x
topology: tpu7x:2x2x1
jax: 0.10.0
libtpu: 0.0.40
codegen_flags: <defaults>
</compile_context>

<pallas_src>
import functools

import numpy as np
import jax
import jax.numpy as jnp
from jax.experimental import pallas as pl
from jax.experimental.pallas import tpu as pltpu


def _round_up(v, m):
    return (v + m - 1) // m * m


def sumchars_kernel(
    x_ref,            # (TB, obs)   bf16
    w0_ref, b0_ref,   # (obs, H)    bf16, (1, H)   f32
    w1_ref, b1_ref,   # (H, H)      bf16, (1, H)   f32
    w2_ref, b2_ref,   # (H, WWp)    bf16, (1, WWp) f32
    words_ref,        # (WWp, NWp)  bf16
    mask_ref,         # (1, NWp)    f32 additive mask: 0 on real lanes, -1e30 on pad
    wa_ref, wx_ref, ba_ref,   # (NWp, H) bf16, (obs, H) bf16, (1, H) f32
    wo_ref, bo_ref,           # (H, Ap)  bf16, (1, Ap) f32
    out_ref,                  # (TB, Ap) f32
):
    f32 = jnp.float32
    bf16 = jnp.bfloat16

    xb = x_ref[...]                      # already bf16 (streamed input)

    # ---- f0: Linear->ReLU, Linear->ReLU (n_hidden=1), Linear->ReLU ----
    h = jnp.dot(xb, w0_ref[...], preferred_element_type=f32) + b0_ref[...]
    h = jnp.maximum(h, 0.0)
    h = jnp.dot(h.astype(bf16), w1_ref[...], preferred_element_type=f32) + b1_ref[...]
    h = jnp.maximum(h, 0.0)
    y = jnp.dot(h.astype(bf16), w2_ref[...], preferred_element_type=f32) + b2_ref[...]
    y = jnp.maximum(y, 0.0)

    # ---- a = log_softmax(y @ words, axis=-1) with additive pad mask ----
    logits = (jnp.dot(y.astype(bf16), words_ref[...], preferred_element_type=f32)
              + mask_ref[...])                       # padded lanes -> ~-1e30 (finite!)
    m = jnp.max(logits, axis=-1, keepdims=True)
    z = logits - m
    s = jnp.sum(jnp.exp(z), axis=-1, keepdims=True)  # exp/log -> EUP slot
    a = z - jnp.log(s)                               # padded lanes huge-negative but finite

    # ---- action_last(concat([a, x], axis=1)) == a @ Wa + x @ Wx ----
    # wa rows for padded word lanes are zero, so padded a-lanes contribute exactly 0.
    h2 = (jnp.dot(a.astype(bf16), wa_ref[...], preferred_element_type=f32)
          + jnp.dot(xb, wx_ref[...], preferred_element_type=f32)
          + ba_ref[...])
    h2 = jnp.maximum(h2, 0.0)
    out_ref[...] = (
        jnp.dot(h2.astype(bf16), wo_ref[...], preferred_element_type=f32) + bo_ref[...])


def sumchars_forward(x, params, *, tile_b=256):
    """x: (B, obs_size). params: unpadded f32 weights (see build_params)."""
    LANE = 128
    SUB = 16          # bf16 LHS packs 16 rows per sublane pair
    bf16, f32 = jnp.bfloat16, jnp.float32

    # Stream x in bf16: halves its per-step DMA and matches the matmul precision.
    x = x.astype(bf16)
    B, obs = x.shape
    H = params["w0"].shape[1]
    WW = params["w2"].shape[1]
    NW = params["words"].shape[1]
    A = params["wo"].shape[1]

    WWp = _round_up(WW, LANE)
    NWp = _round_up(NW, LANE)
    Ap = _round_up(A, LANE)

    def pad2(arr, rows, cols, dtype):
        return jnp.pad(arr, ((0, rows - arr.shape[0]), (0, cols - arr.shape[1]))).astype(dtype)

    # Pad lane dims with zeros (zero cols of W + zero bias keep the math exact),
    # cast matmul weights to bf16, keep biases in f32.
    w0 = params["w0"].astype(bf16)
    b0 = params["b0"].astype(f32)
    w1 = params["w1"].astype(bf16)
    b1 = params["b1"].astype(f32)
    w2 = pad2(params["w2"], H, WWp, bf16)
    b2 = pad2(params["b2"], 1, WWp, f32)
    words = pad2(params["words"], WWp, NWp, bf16)   # one-hot: exact in bf16
    wa = pad2(params["wa"], NWp, H, bf16)           # zero rows for padded word lanes
    wx = params["wx"].astype(bf16)
    ba = params["ba"].astype(f32)
    wo = pad2(params["wo"], H, Ap, bf16)
    bo = pad2(params["bo"], 1, Ap, f32)

    # Additive log-softmax mask over padded word lanes (finite -1e30, NOT -inf:
    # the finite value times wa's zero rows stays exactly 0 in f32 accumulation).
    mask = jnp.where(jnp.arange(NWp) < NW, 0.0, -1e30).astype(f32).reshape(1, NWp)

    # Batch tiling: TB multiple of 16 (bf16 sublane packing); large tiles fill the
    # MXU M dimension and amortize the ~0.35 us per-grid-step overhead, but cap TB
    # so the "parallel" batch axis gets >=2 grid steps whenever the batch can be
    # split (keeps both v7x TensorCores busy).
    B16 = _round_up(B, SUB)
    TB = min(_round_up(tile_b, SUB), B16)
    if B16 >= 2 * SUB and B16 <= TB:
        TB = _round_up(pl.cdiv(B16, 2), SUB)
    Bp = _round_up(B16, TB)
    if Bp != B:
        x = jnp.pad(x, ((0, Bp - B), (0, 0)))

    operands = (x, w0, b0, w1, b1, w2, b2, words, mask, wa, wx, ba, wo, bo)

    def resident(arr):
        # Weights: full-array block, constant index_map -> VMEM-resident across
        # steps; single-buffered since they are never re-fetched.
        return pl.BlockSpec(arr.shape, lambda i: (0, 0), pipeline_mode=pl.Buffered(1))

    in_specs = [pl.BlockSpec((TB, obs), lambda i: (i, 0))]
    in_specs += [resident(o) for o in operands[1:]]

    out = pl.pallas_call(
        sumchars_kernel,
        out_shape=jax.ShapeDtypeStruct((Bp, Ap), f32),
        grid=(Bp // TB,),
        in_specs=in_specs,
        out_specs=pl.BlockSpec((TB, Ap), lambda i: (i, 0)),
        compiler_params=pltpu.CompilerParams(
            dimension_semantics=("parallel",),       # 2-TC sharding on v7x
            vmem_limit_bytes=32 * 1024 * 1024,       # explicit budget (v5e default is 16 MiB)
        ),
    )(*operands)

    # Slice off batch padding and lane padding of the action dimension.
    return out[:B, :A]


def build_params(key, obs_size, hidden_size, word_list, word_max_len, action_size):
    """Deterministic synthetic parameter init (matches SumChars.__init__ shapes)."""
    force_word_list = [w for w in word_list if len(w) <= word_max_len]
    words_width = word_max_len * 26
    n_words = len(force_word_list)

    # Word one-hot matrix, identical construction to the PyTorch module
    # (assumes uppercase A-Z words, same as the original code).
    word_array = np.zeros((words_width, n_words), dtype=np.float32)
    for i, word in enumerate(force_word_list):
        for j, c in enumerate(word):
            word_array[j * 26 + (ord(c) - ord('A')), i] = 1.0

    keys = jax.random.split(key, 10)

    def dense(k, fan_in, fan_out):
        return 0.1 * jax.random.normal(k, (fan_in, fan_out), dtype=jnp.float32)

    params = {
        "w0": dense(keys[0], obs_size, hidden_size),
        "b0": 0.01 * jax.random.normal(keys[1], (1, hidden_size), dtype=jnp.float32),
        "w1": dense(keys[2], hidden_size, hidden_size),
        "b1": 0.01 * jax.random.normal(keys[3], (1, hidden_size), dtype=jnp.float32),
        "w2": dense(keys[4], hidden_size, words_width),
        "b2": 0.01 * jax.random.normal(keys[5], (1, words_width), dtype=jnp.float32),
        "words": jnp.asarray(word_array),
        # action_last first Linear has input dim (n_words + obs_size); split it:
        "wa": dense(keys[6], n_words, hidden_size),
        "wx": dense(keys[7], obs_size, hidden_size),
        "ba": 0.01 * jax.random.normal(keys[8], (1, hidden_size), dtype=jnp.float32),
        "wo": dense(keys[9], hidden_size, action_size),
        "bo": jnp.zeros((1, action_size), dtype=jnp.float32),
    }
    return params


def reference_forward(x, p):
    """Plain-JAX reference mirroring the PyTorch forward (bf16 matmuls, f32 math)."""
    bf16, f32 = jnp.bfloat16, jnp.float32

    def mm(a, w):
        return jnp.dot(a.astype(bf16), w.astype(bf16), preferred_element_type=f32)

    x = x.astype(f32)
    h = jax.nn.relu(mm(x, p["w0"]) + p["b0"])
    h = jax.nn.relu(mm(h, p["w1"]) + p["b1"])
    y = jax.nn.relu(mm(h, p["w2"]) + p["b2"])
    a = jax.nn.log_softmax(mm(y, p["words"]), axis=-1)
    h2 = jax.nn.relu(mm(a, p["wa"]) + mm(x, p["wx"]) + p["ba"])
    return mm(h2, p["wo"]) + p["bo"]


if __name__ == "__main__":
    obs_size = 32
    hidden_size = 256     # module default; multiple of 128 -> MXU friendly
    word_max_len = 5
    action_size = 8
    word_list = ["APPLE", "BREAD", "CRANE", "ABOUT", "HELLO", "WORLD", "QUILT", "ZEBRA"]
    batch = 32            # -> TB=16 (bf16 sublane-packed), grid=(2,): exercises the
                          #    batch pipeline and gives v7x's 2 TensorCores a step each.

    key = jax.random.PRNGKey(0)
    k_params, k_x = jax.random.split(key)
    params = build_params(k_params, obs_size, hidden_size, word_list,
                          word_max_len, action_size)
    x = jax.random.normal(k_x, (batch, obs_size), dtype=jnp.float32)

    out = jax.block_until_ready(sumchars_forward(x, params))

    ref = reference_forward(x, params)
    np.testing.assert_allclose(np.asarray(out), np.asarray(ref), rtol=2e-3, atol=2e-3)

    print("KERNEL_OK")
</pallas_src>

<mosaic_0001>
module attributes {stable_mosaic.version = 11 : i64} {
  func.func @sumchars_kernel(%arg0: i32, %arg1: memref<16x32xbf16, #tpu.memory_space<vmem>>, %arg2: memref<32x256xbf16, #tpu.memory_space<vmem>>, %arg3: memref<1x256xf32, #tpu.memory_space<vmem>>, %arg4: memref<256x256xbf16, #tpu.memory_space<vmem>>, %arg5: memref<1x256xf32, #tpu.memory_space<vmem>>, %arg6: memref<256x256xbf16, #tpu.memory_space<vmem>>, %arg7: memref<1x256xf32, #tpu.memory_space<vmem>>, %arg8: memref<256x128xbf16, #tpu.memory_space<vmem>>, %arg9: memref<1x128xf32, #tpu.memory_space<vmem>>, %arg10: memref<128x256xbf16, #tpu.memory_space<vmem>>, %arg11: memref<32x256xbf16, #tpu.memory_space<vmem>>, %arg12: memref<1x256xf32, #tpu.memory_space<vmem>>, %arg13: memref<256x128xbf16, #tpu.memory_space<vmem>>, %arg14: memref<1x128xf32, #tpu.memory_space<vmem>>, %arg15: memref<16x128xf32, #tpu.memory_space<vmem>>) attributes {dimension_semantics = [#tpu.dimension_semantics<parallel>], iteration_bounds = array<i64: 2>, scalar_prefetch = 0 : i64, scratch_operands = 0 : i64, tpu.core_type = #tpu.core_type<tc>, window_params = [{transform_indices = @transform_0, window_bounds = array<i64: 16, 32>}, {pipeline_mode = #tpu.pipeline_mode<synchronous>, transform_indices = @transform_1, window_bounds = array<i64: 32, 256>}, {pipeline_mode = #tpu.pipeline_mode<synchronous>, transform_indices = @transform_2, window_bounds = array<i64: 1, 256>}, {pipeline_mode = #tpu.pipeline_mode<synchronous>, transform_indices = @transform_3, window_bounds = array<i64: 256, 256>}, {pipeline_mode = #tpu.pipeline_mode<synchronous>, transform_indices = @transform_4, window_bounds = array<i64: 1, 256>}, {pipeline_mode = #tpu.pipeline_mode<synchronous>, transform_indices = @transform_5, window_bounds = array<i64: 256, 256>}, {pipeline_mode = #tpu.pipeline_mode<synchronous>, transform_indices = @transform_6, window_bounds = array<i64: 1, 256>}, {pipeline_mode = #tpu.pipeline_mode<synchronous>, transform_indices = @transform_7, window_bounds = array<i64: 256, 128>}, {pipeline_mode = #tpu.pipeline_mode<synchronous>, transform_indices = @transform_8, window_bounds = array<i64: 1, 128>}, {pipeline_mode = #tpu.pipeline_mode<synchronous>, transform_indices = @transform_9, window_bounds = array<i64: 128, 256>}, {pipeline_mode = #tpu.pipeline_mode<synchronous>, transform_indices = @transform_10, window_bounds = array<i64: 32, 256>}, {pipeline_mode = #tpu.pipeline_mode<synchronous>, transform_indices = @transform_11, window_bounds = array<i64: 1, 256>}, {pipeline_mode = #tpu.pipeline_mode<synchronous>, transform_indices = @transform_12, window_bounds = array<i64: 256, 128>}, {pipeline_mode = #tpu.pipeline_mode<synchronous>, transform_indices = @transform_13, window_bounds = array<i64: 1, 128>}, {transform_indices = @transform_14, window_bounds = array<i64: 16, 128>}]} {
    %c0 = arith.constant 0 : index
    %c0_0 = arith.constant 0 : index
    %0 = vector.load %arg1[%c0, %c0_0] : memref<16x32xbf16, #tpu.memory_space<vmem>>, vector<16x32xbf16>
    %c0_1 = arith.constant 0 : index
    %c0_2 = arith.constant 0 : index
    %1 = vector.load %arg2[%c0_1, %c0_2] : memref<32x256xbf16, #tpu.memory_space<vmem>>, vector<32x256xbf16>
    %cst = arith.constant dense<0.000000e+00> : vector<16x256xf32>
    %2 = tpu.matmul %0, %1, %cst {dimension_numbers = #tpu.dot_dimension_numbers<[1], [0], [0], [1], [0, 0, 1, 1], [], []>} : vector<16x32xbf16>, vector<32x256xbf16>, vector<16x256xf32> -> vector<16x256xf32>
    %c0_3 = arith.constant 0 : index
    %c0_4 = arith.constant 0 : index
    %3 = vector.load %arg3[%c0_3, %c0_4] : memref<1x256xf32, #tpu.memory_space<vmem>>, vector<1x256xf32>
    %4 = vector.broadcast %3 : vector<1x256xf32> to vector<16x256xf32>
    %5 = arith.addf %2, %4 : vector<16x256xf32>
    %cst_5 = arith.constant 0.000000e+00 : f32
    %6 = vector.broadcast %cst_5 : f32 to vector<16x256xf32>
    %7 = arith.maximumf %5, %6 : vector<16x256xf32>
    %8 = arith.truncf %7 : vector<16x256xf32> to vector<16x256xbf16>
    %c0_6 = arith.constant 0 : index
    %c0_7 = arith.constant 0 : index
    %9 = vector.load %arg4[%c0_6, %c0_7] : memref<256x256xbf16, #tpu.memory_space<vmem>>, vector<256x256xbf16>
    %cst_8 = arith.constant dense<0.000000e+00> : vector<16x256xf32>
    %10 = tpu.matmul %8, %9, %cst_8 {dimension_numbers = #tpu.dot_dimension_numbers<[1], [0], [0], [1], [0, 0, 1, 1], [], []>} : vector<16x256xbf16>, vector<256x256xbf16>, vector<16x256xf32> -> vector<16x256xf32>
    %c0_9 = arith.constant 0 : index
    %c0_10 = arith.constant 0 : index
    %11 = vector.load %arg5[%c0_9, %c0_10] : memref<1x256xf32, #tpu.memory_space<vmem>>, vector<1x256xf32>
    %12 = vector.broadcast %11 : vector<1x256xf32> to vector<16x256xf32>
    %13 = arith.addf %10, %12 : vector<16x256xf32>
    %cst_11 = arith.constant 0.000000e+00 : f32
    %14 = vector.broadcast %cst_11 : f32 to vector<16x256xf32>
    %15 = arith.maximumf %13, %14 : vector<16x256xf32>
    %16 = arith.truncf %15 : vector<16x256xf32> to vector<16x256xbf16>
    %c0_12 = arith.constant 0 : index
    %c0_13 = arith.constant 0 : index
    %17 = vector.load %arg6[%c0_12, %c0_13] : memref<256x256xbf16, #tpu.memory_space<vmem>>, vector<256x256xbf16>
    %cst_14 = arith.constant dense<0.000000e+00> : vector<16x256xf32>
    %18 = tpu.matmul %16, %17, %cst_14 {dimension_numbers = #tpu.dot_dimension_numbers<[1], [0], [0], [1], [0, 0, 1, 1], [], []>} : vector<16x256xbf16>, vector<256x256xbf16>, vector<16x256xf32> -> vector<16x256xf32>
    %c0_15 = arith.constant 0 : index
    %c0_16 = arith.constant 0 : index
    %19 = vector.load %arg7[%c0_15, %c0_16] : memref<1x256xf32, #tpu.memory_space<vmem>>, vector<1x256xf32>
    %20 = vector.broadcast %19 : vector<1x256xf32> to vector<16x256xf32>
    %21 = arith.addf %18, %20 : vector<16x256xf32>
    %cst_17 = arith.constant 0.000000e+00 : f32
    %22 = vector.broadcast %cst_17 : f32 to vector<16x256xf32>
    %23 = arith.maximumf %21, %22 : vector<16x256xf32>
    %24 = arith.truncf %23 : vector<16x256xf32> to vector<16x256xbf16>
    %c0_18 = arith.constant 0 : index
    %c0_19 = arith.constant 0 : index
    %25 = vector.load %arg8[%c0_18, %c0_19] : memref<256x128xbf16, #tpu.memory_space<vmem>>, vector<256x128xbf16>
    %cst_20 = arith.constant dense<0.000000e+00> : vector<16x128xf32>
    %26 = tpu.matmul %24, %25, %cst_20 {dimension_numbers = #tpu.dot_dimension_numbers<[1], [0], [0], [1], [0, 0, 1, 1], [], []>} : vector<16x256xbf16>, vector<256x128xbf16>, vector<16x128xf32> -> vector<16x128xf32>
    %c0_21 = arith.constant 0 : index
    %c0_22 = arith.constant 0 : index
    %27 = vector.load %arg9[%c0_21, %c0_22] : memref<1x128xf32, #tpu.memory_space<vmem>>, vector<1x128xf32>
    %28 = vector.broadcast %27 : vector<1x128xf32> to vector<16x128xf32>
    %29 = arith.addf %26, %28 : vector<16x128xf32>
    %cst_23 = arith.constant dense<0xFF800000> : vector<16xf32>
    %30 = vector.multi_reduction <maximumf>, %29, %cst_23 [1] : vector<16x128xf32> to vector<16xf32>
    %31 = vector.shape_cast %30 : vector<16xf32> to vector<16x1xf32>
    %32 = vector.broadcast %31 : vector<16x1xf32> to vector<16x128xf32>
    %33 = arith.subf %29, %32 : vector<16x128xf32>
    %34 = math.exp %33 : vector<16x128xf32>
    %cst_24 = arith.constant dense<0.000000e+00> : vector<16xf32>
    %35 = vector.multi_reduction <add>, %34, %cst_24 [1] : vector<16x128xf32> to vector<16xf32>
    %36 = vector.shape_cast %35 : vector<16xf32> to vector<16x1xf32>
    %37 = math.log %36 : vector<16x1xf32>
    %38 = vector.broadcast %37 : vector<16x1xf32> to vector<16x128xf32>
    %39 = arith.subf %33, %38 : vector<16x128xf32>
    %40 = arith.truncf %39 : vector<16x128xf32> to vector<16x128xbf16>
    %c0_25 = arith.constant 0 : index
    %c0_26 = arith.constant 0 : index
    %41 = vector.load %arg10[%c0_25, %c0_26] : memref<128x256xbf16, #tpu.memory_space<vmem>>, vector<128x256xbf16>
    %cst_27 = arith.constant dense<0.000000e+00> : vector<16x256xf32>
    %42 = tpu.matmul %40, %41, %cst_27 {dimension_numbers = #tpu.dot_dimension_numbers<[1], [0], [0], [1], [0, 0, 1, 1], [], []>} : vector<16x128xbf16>, vector<128x256xbf16>, vector<16x256xf32> -> vector<16x256xf32>
    %c0_28 = arith.constant 0 : index
    %c0_29 = arith.constant 0 : index
    %43 = vector.load %arg11[%c0_28, %c0_29] : memref<32x256xbf16, #tpu.memory_space<vmem>>, vector<32x256xbf16>
    %cst_30 = arith.constant dense<0.000000e+00> : vector<16x256xf32>
    %44 = tpu.matmul %0, %43, %cst_30 {dimension_numbers = #tpu.dot_dimension_numbers<[1], [0], [0], [1], [0, 0, 1, 1], [], []>} : vector<16x32xbf16>, vector<32x256xbf16>, vector<16x256xf32> -> vector<16x256xf32>
    %45 = arith.addf %42, %44 : vector<16x256xf32>
    %c0_31 = arith.constant 0 : index
    %c0_32 = arith.constant 0 : index
    %46 = vector.load %arg12[%c0_31, %c0_32] : memref<1x256xf32, #tpu.memory_space<vmem>>, vector<1x256xf32>
    %47 = vector.broadcast %46 : vector<1x256xf32> to vector<16x256xf32>
    %48 = arith.addf %45, %47 : vector<16x256xf32>
    %cst_33 = arith.constant 0.000000e+00 : f32
    %49 = vector.broadcast %cst_33 : f32 to vector<16x256xf32>
    %50 = arith.maximumf %48, %49 : vector<16x256xf32>
    %51 = arith.truncf %50 : vector<16x256xf32> to vector<16x256xbf16>
    %c0_34 = arith.constant 0 : index
    %c0_35 = arith.constant 0 : index
    %52 = vector.load %arg13[%c0_34, %c0_35] : memref<256x128xbf16, #tpu.memory_space<vmem>>, vector<256x128xbf16>
    %cst_36 = arith.constant dense<0.000000e+00> : vector<16x128xf32>
    %53 = tpu.matmul %51, %52, %cst_36 {dimension_numbers = #tpu.dot_dimension_numbers<[1], [0], [0], [1], [0, 0, 1, 1], [], []>} : vector<16x256xbf16>, vector<256x128xbf16>, vector<16x128xf32> -> vector<16x128xf32>
    %c0_37 = arith.constant 0 : index
    %c0_38 = arith.constant 0 : index
    %54 = vector.load %arg14[%c0_37, %c0_38] : memref<1x128xf32, #tpu.memory_space<vmem>>, vector<1x128xf32>
    %55 = vector.broadcast %54 : vector<1x128xf32> to vector<16x128xf32>
    %56 = arith.addf %53, %55 : vector<16x128xf32>
    %c0_39 = arith.constant 0 : index
    %c0_40 = arith.constant 0 : index
    %57 = vector.load %arg15[%c0_39, %c0_40] : memref<16x128xf32, #tpu.memory_space<vmem>>, vector<16x128xf32>
    tpu.vector_store %arg15[%c0_39, %c0_40], %56 {strides = array<i32>} : memref<16x128xf32, #tpu.memory_space<vmem>>, vector<16x128xf32>,
    return
  }
  func.func @transform_0(%arg0: i32) -> (i32, i32) {
    %c0_i32 = arith.constant 0 : i32
    %c0_i32_0 = arith.constant 0 : i32
    return %arg0, %c0_i32 : i32, i32
  }
  func.func @transform_1(%arg0: i32) -> (i32, i32) {
    %c0_i32 = arith.constant 0 : i32
    %c0_i32_0 = arith.constant 0 : i32
    %c0_i32_1 = arith.constant 0 : i32
    return %c0_i32, %c0_i32_0 : i32, i32
  }
  func.func @transform_2(%arg0: i32) -> (i32, i32) {
    %c0_i32 = arith.constant 0 : i32
    %c0_i32_0 = arith.constant 0 : i32
    %c0_i32_1 = arith.constant 0 : i32
    return %c0_i32, %c0_i32_0 : i32, i32
  }
  func.func @transform_3(%arg0: i32) -> (i32, i32) {
    %c0_i32 = arith.constant 0 : i32
    %c0_i32_0 = arith.constant 0 : i32
    %c0_i32_1 = arith.constant 0 : i32
    return %c0_i32, %c0_i32_0 : i32, i32
  }
  func.func @transform_4(%arg0: i32) -> (i32, i32) {
    %c0_i32 = arith.constant 0 : i32
    %c0_i32_0 = arith.constant 0 : i32
    %c0_i32_1 = arith.constant 0 : i32
    return %c0_i32, %c0_i32_0 : i32, i32
  }
  func.func @transform_5(%arg0: i32) -> (i32, i32) {
    %c0_i32 = arith.constant 0 : i32
    %c0_i32_0 = arith.constant 0 : i32
    %c0_i32_1 = arith.constant 0 : i32
    return %c0_i32, %c0_i32_0 : i32, i32
  }
  func.func @transform_6(%arg0: i32) -> (i32, i32) {
    %c0_i32 = arith.constant 0 : i32
    %c0_i32_0 = arith.constant 0 : i32
    %c0_i32_1 = arith.constant 0 : i32
    return %c0_i32, %c0_i32_0 : i32, i32
  }
  func.func @transform_7(%arg0: i32) -> (i32, i32) {
    %c0_i32 = arith.constant 0 : i32
    %c0_i32_0 = arith.constant 0 : i32
    %c0_i32_1 = arith.constant 0 : i32
    return %c0_i32, %c0_i32_0 : i32, i32
  }
  func.func @transform_8(%arg0: i32) -> (i32, i32) {
    %c0_i32 = arith.constant 0 : i32
    %c0_i32_0 = arith.constant 0 : i32
    %c0_i32_1 = arith.constant 0 : i32
    return %c0_i32, %c0_i32_0 : i32, i32
  }
  func.func @transform_9(%arg0: i32) -> (i32, i32) {
    %c0_i32 = arith.constant 0 : i32
    %c0_i32_0 = arith.constant 0 : i32
    %c0_i32_1 = arith.constant 0 : i32
    return %c0_i32, %c0_i32_0 : i32, i32
  }
  func.func @transform_10(%arg0: i32) -> (i32, i32) {
    %c0_i32 = arith.constant 0 : i32
    %c0_i32_0 = arith.constant 0 : i32
    %c0_i32_1 = arith.constant 0 : i32
    return %c0_i32, %c0_i32_0 : i32, i32
  }
  func.func @transform_11(%arg0: i32) -> (i32, i32) {
    %c0_i32 = arith.constant 0 : i32
    %c0_i32_0 = arith.constant 0 : i32
    %c0_i32_1 = arith.constant 0 : i32
    return %c0_i32, %c0_i32_0 : i32, i32
  }
  func.func @transform_12(%arg0: i32) -> (i32, i32) {
    %c0_i32 = arith.constant 0 : i32
    %c0_i32_0 = arith.constant 0 : i32
    %c0_i32_1 = arith.constant 0 : i32
    return %c0_i32, %c0_i32_0 : i32, i32
  }
  func.func @transform_13(%arg0: i32) -> (i32, i32) {
    %c0_i32 = arith.constant 0 : i32
    %c0_i32_0 = arith.constant 0 : i32
    %c0_i32_1 = arith.constant 0 : i32
    return %c0_i32, %c0_i32_0 : i32, i32
  }
  func.func @transform_14(%arg0: i32) -> (i32, i32) {
    %c0_i32 = arith.constant 0 : i32
    %c0_i32_0 = arith.constant 0 : i32
    return %arg0, %c0_i32 : i32, i32
  }
}

</mosaic_0001>

<bundles_post_ra>
// kernel: tpu_custom_call.1
= control target key start
LH: loop header
LB: loop body
LE: loop exit
PB: predicated region body
PF: predicated region fallthrough
CT: control target
= control target key end

     0   :  { %s3264_s0 = inlined_call_operand.hbm [shape: bf16[32,32], index: 0, kind: input, shape index: {}]   ;;  %s3265_s1 = inlined_call_operand.hbm [shape: bf16[32,256], index: 1, kind: input, shape index: {}]   ;;  %s3266_s2 = inlined_call_operand.vmem [shape: f32[1,256], index: 2, kind: input, shape index: {}]   ;;  %s3267_s3 = inlined_call_operand.hbm [shape: bf16[256,256], index: 3, kind: input, shape index: {}]   ;;  %s3268_s4 = inlined_call_operand.vmem [shape: f32[1,256], index: 4, kind: input, shape index: {}]   ;;  %s3269_s5 = inlined_call_operand.hbm [shape: bf16[256,256], index: 5, kind: input, shape index: {}]   ;;  %s3270_s6 = inlined_call_operand.hbm [shape: f32[1,256], index: 6, kind: input, shape index: {}]   ;;  %s3271_s7 = inlined_call_operand.hbm [shape: bf16[256,128], index: 7, kind: input, shape index: {}]   ;;  %s3272_s8 = inlined_call_operand.vmem [shape: f32[1,128], index: 8, kind: input, shape index: {}]   ;;  %s3273_s9 = inlined_call_operand.hbm [shape: bf16[128,256], index: 9, kind: input, shape index: {}]   ;;  %s3274_s10 = inlined_call_operand.vmem [shape: bf16[32,256], index: 10, kind: input, shape index: {}]   ;;  %s3275_s11 = inlined_call_operand.vmem [shape: f32[1,256], index: 11, kind: input, shape index: {}]   ;;  %s3276_s12 = inlined_call_operand.hbm [shape: bf16[256,128], index: 12, kind: input, shape index: {}]   ;;  %s3277_s13 = inlined_call_operand.vmem [shape: f32[1,128], index: 13, kind: input, shape index: {}]   ;;  %s3278_s14 = inlined_call_operand.hbm [shape: f32[32,128], index: 14, kind: output, shape index: {}]  }
   0x1   :  { %3290 = sst [smem:[#allocation23_spill]] %s3265_s1 }
   0x2   :  { %3291 = sst [smem:[#allocation24_spill]] %s3268_s4 }
   0x3   :  { %3292 = sst [smem:[#allocation25_spill]] %s3269_s5 }
   0x4   :  { %3293 = sst [smem:[#allocation26_spill]] %s3272_s8 }
   0x5   :  { %3294 = sst [smem:[#allocation27_spill]] %s3274_s10 }
   0x6   :  { %3295 = sst [smem:[#allocation28_spill]] %s3275_s11 }
   0x7   :  { %3296 = sst [smem:[#allocation29_spill]] %s3277_s13 }
   0x8   :  { %3297 = sst [smem:[#allocation30_spill]] %s3278_s14 }
   0x9   :  { %19 = vsyncpa [#allocation3], 0 }
   0xa   :  { %21 = vsyncpa [#allocation3 + $0x1], 0 }
   0xb   :  { %22 = vsyncpa [#allocation6], 0 }
   0xc   :  { %23 = vsyncpa [#allocation9], 0 }
   0xd   :  { %24 = vsyncpa [#allocation12], 0 }
   0xe   :  { %25 = vsyncpa [#allocation15], 0 }
   0xf   :  { %26 = vsyncpa [#allocation4], 0 }
  0x10   :  { %28 = vsyncpa [#allocation4 + $0x1], 0  ;;  %s2849_s29 = smov 0   ;;  %s2851_s30 = smov 0  }
  0x11   :  { %s2853_s15 = smov 0   ;;  %s2855_s16 = smov 0  }
  0x12 LB: > { %s2758_s17 = smov [#allocation5]   ;;  %s2870_s19 = sadd.s32 4294967295, %s2756_s16   ;;  %s2756_s16 = sphi %s2855_s16, %s3332_s16   ;;  %s2752_s15 = sphi %s2853_s15, %s3331_s15   ;;  %s2748_s30 = sphi %s2851_s30, %s3330_s30   ;;  %s2744_s29 = sphi %s2849_s29, %s3329_s29  }
  0x13   : > { %s376_s18 = sshll.u32 %s2758_s17, 4  ;;  %p1949_p0 = scmp.ge.s32.totalorder %s2756_s16, 1  ;;  %s2875_s18 = int_to_ptr.vmem [resolvable:$true] %s376_s18 }
  0x14   : > { %p3285_p1 = scmp.eq.s32.totalorder %s2870_s19, 0  ;;  %p364_p2 = scmp.lt.s32.totalorder %s2756_s16, 3 }
  0x15   : > { %s2759_s21 = smov [#allocation8]   ;;  %s2760_s24 = smov [#allocation11]  }
  0x16   : > { %p2877_p3 = pnand %p1949_p0, %p364_p2  ;;  %s408_s22 = sshll.u32 %s2759_s21, 4  ;;  %s2890_s22 = int_to_ptr.vmem [resolvable:$true] %s408_s22 }
  0x17   : > { %s432_s25 = sshll.u32 %s2760_s24, 4  ;;  %s3300_s1 = sld [smem:[#allocation23_spill]]  ;;  %s2892_s25 = int_to_ptr.vmem [resolvable:$true] %s432_s25 }
  0x18   : > { %s3298_s20 = scalar_select %p2877_p3, 1, 0 }
  0x19   : > { %p2183_p5 = pneg %p2877_p3 }
  0x1b   : > { %p2886_p6 = pnand %p2183_p5, %p3285_p1 }
  0x1d   : > { %s2448_s28 = scalar_lea.hbm %s3300_s1, 512  ;;  %p2902_p8 = pneg %p2886_p6 }
  0x1e   : > { %p2449_p7 = scmp.ne.s32.totalorder %s3300_s1, %s2448_s28  ;;  %p2455_p11 = scmp.lt.u32.totalorder %s2448_s28, %s3300_s1 }
  0x20   : > { %p2451_p9 = pnand %p2902_p8, %p2449_p7 }
  0x22   : > { %p2452_p10 = pneg %p2451_p9 }
  0x24   : > { %p2457_p12 = pnand %p2455_p11, %p2452_p10 }
  0x26   : > { %2460 = shalt.err (!%p2457_p12)
}
  0x27   : > { %s2461_s14 = scalar_lea.vmem %s2875_s18, 512  ;;  %p2469_p5 = scmp.lt.s32.totalorder %s2875_s18, %s2875_s18 }
  0x28   : > { %p2462_p13 = scmp.ne.s32.totalorder %s2875_s18, %s2461_s14  ;;  %p2470_p4 = scmp.lt.s32.totalorder %s2461_s14, %s2461_s14 }
  0x2a   : > { %p2464_p0 = pnand %p2462_p13, %p2902_p8  ;;  %p2471_p7 = por %p2470_p4, %p2469_p5 }
  0x2c   : > { %p2465_p2 = pneg %p2464_p0 }
  0x2e   : > { %p2472_p9 = pnand %p2471_p7, %p2465_p2 }
  0x30   : > { %2475 = shalt.err (!%p2472_p9)
}
  0x31   : > { %s3281_s26 = smov 128   ;;  %s3283_s13 = smov 8  }
  0x32   : > { %2186 = dma.hbm_to_vmem [thread:$0]  (!%p2886_p6), %s3300_s1, 512, %s2875_s18, [#allocation6], %s3281_s26, %s3281_s26, %s3283_s13  }
  0x33   : > { %s3302_s5 = sld [smem:[#allocation25_spill]] }
  0x39   : > { %s2476_s14 = scalar_lea.hbm %s3302_s5, 4096 }
  0x3a   : > { %p2477_p4 = scmp.ne.s32.totalorder %s3302_s5, %s2476_s14  ;;  %p2483_p12 = scmp.lt.u32.totalorder %s2476_s14, %s3302_s5 }
  0x3c   : > { %p2479_p10 = pnand %p2477_p4, %p2902_p8 }
  0x3e   : > { %p2480_p11 = pneg %p2479_p10 }
  0x40   : > { %p2485_p13 = pnand %p2483_p12, %p2480_p11 }
  0x42   : > { %2488 = shalt.err (!%p2485_p13)
}
  0x43   : > { %s2489_s18 = scalar_lea.vmem %s2890_s22, 4096  ;;  %p2497_p7 = scmp.lt.s32.totalorder %s2890_s22, %s2890_s22 }
  0x44   : > { %p2490_p0 = scmp.ne.s32.totalorder %s2890_s22, %s2489_s18  ;;  %p2498_p9 = scmp.lt.s32.totalorder %s2489_s18, %s2489_s18 }
  0x46   : > { %p2492_p2 = pnand %p2490_p0, %p2902_p8  ;;  %p2499_p4 = por %p2498_p9, %p2497_p7 }
  0x48   : > { %p2493_p5 = pneg %p2492_p2 }
  0x4a   : > { %p2500_p10 = pnand %p2499_p4, %p2493_p5 }
  0x4c   : > { %2503 = shalt.err (!%p2500_p10)
}
  0x4d   : > { %2192 = dma.hbm_to_vmem [thread:$0]  (!%p2886_p6), %s3302_s5, 4096, %s2890_s22, [#allocation9], %s3281_s26, %s3281_s26, %s3283_s13  }
  0x4e   : > { %s2504_s27 = scalar_lea.hbm %s3271_s7, 2048 }
  0x4f   : > { %p2505_p11 = scmp.ne.s32.totalorder %s3271_s7, %s2504_s27  ;;  %p2511_p0 = scmp.lt.u32.totalorder %s2504_s27, %s3271_s7 }
  0x51   : > { %p2507_p12 = pnand %p2505_p11, %p2902_p8 }
  0x53   : > { %p2508_p13 = pneg %p2507_p12 }
  0x55   : > { %p2513_p2 = pnand %p2511_p0, %p2508_p13 }
  0x57   : > { %2516 = shalt.err (!%p2513_p2)
}
  0x58   : > { %s2517_s22 = scalar_lea.vmem %s2892_s25, 2048  ;;  %p2525_p4 = scmp.lt.s32.totalorder %s2892_s25, %s2892_s25 }
  0x59   : > { %p2518_p5 = scmp.ne.s32.totalorder %s2892_s25, %s2517_s22  ;;  %p2526_p10 = scmp.lt.s32.totalorder %s2517_s22, %s2517_s22 }
  0x5b   : > { %p2520_p7 = pnand %p2518_p5, %p2902_p8  ;;  %p2527_p11 = por %p2526_p10, %p2525_p4 }
  0x5d   : > { %p2521_p9 = pneg %p2520_p7 }
  0x5f   : > { %p2528_p12 = pnand %p2527_p11, %p2521_p9 }
  0x61   : > { %2531 = shalt.err (!%p2528_p12)
}
  0x62   : > { %s3287_s18 = smov 64   ;;  %s2764_s4 = smov 4  }
  0x63   : > { %2198 = dma.hbm_to_vmem [thread:$0]  (!%p2886_p6), %s3271_s7, 2048, %s2892_s25, [#allocation12], %s3287_s18, %s3287_s18, %s2764_s4  }
  0x64   : > { %s2765_s11 = smov [#allocation7]   ;;  %s2766_s28 = smov [#allocation10]  }
  0x65   : > { %s392_s27 = sshll.u32 %s2765_s11, 4  ;;  %s422_s17 = sshll.u32 %s2766_s28, 4  ;;  %s393_s27 = int_to_ptr.vmem [resolvable:$true] %s392_s27  ;;  %s423_s17 = int_to_ptr.vmem [resolvable:$true] %s422_s17 }
  0x66   : > { %s2532_s22 = scalar_lea.hbm %s3267_s3, 4096 }
  0x67   : > { %p2533_p13 = scmp.ne.s32.totalorder %s3267_s3, %s2532_s22  ;;  %p2539_p5 = scmp.lt.u32.totalorder %s2532_s22, %s3267_s3 }
  0x69   : > { %p2535_p0 = pnand %p2533_p13, %p2902_p8 }
  0x6b   : > { %p2536_p2 = pneg %p2535_p0 }
  0x6d   : > { %p2541_p7 = pnand %p2539_p5, %p2536_p2 }
  0x6f   : > { %2544 = shalt.err (!%p2541_p7)
}
  0x70   : > { %s2545_s25 = scalar_lea.vmem %s393_s27, 4096  ;;  %p2553_p11 = scmp.lt.s32.totalorder %s393_s27, %s393_s27 }
  0x71   : > { %p2546_p9 = scmp.ne.s32.totalorder %s393_s27, %s2545_s25  ;;  %p2554_p12 = scmp.lt.s32.totalorder %s2545_s25, %s2545_s25 }
  0x73   : > { %p2548_p4 = pnand %p2546_p9, %p2902_p8  ;;  %p2555_p1 = por %p2554_p12, %p2553_p11 }
  0x75   : > { %p2549_p10 = pneg %p2548_p4 }
  0x77   : > { %p2556_p3 = pnand %p2555_p1, %p2549_p10 }
  0x79   : > { %2559 = shalt.err (!%p2556_p3)
}
  0x7a   : > { %s3303_s26 = smov 8   ;;  %s3304_s13 = smov 128  }
  0x7b   : > { %2189 = dma.hbm_to_vmem [thread:$0]  (!%p2886_p6), %s3267_s3, 4096, %s393_s27, [#allocation6], %s3304_s13, %s3304_s13, %s3303_s26  }
  0x7c   : > { %s2560_s11 = scalar_lea.hbm %s3270_s6, 32 }
  0x7d   : > { %p2561_p1 = scmp.ne.s32.totalorder %s3270_s6, %s2560_s11  ;;  %p2567_p0 = scmp.lt.u32.totalorder %s2560_s11, %s3270_s6 }
  0x7f   : > { %p2563_p3 = pnand %p2561_p1, %p2902_p8 }
  0x81   : > { %p2564_p13 = pneg %p2563_p3 }
  0x83   : > { %p2569_p2 = pnand %p2567_p0, %p2564_p13 }
  0x85   : > { %2572 = shalt.err (!%p2569_p2)
}
  0x86   : > { %s2573_s25 = scalar_lea.vmem %s423_s17, 32  ;;  %p2581_p4 = scmp.lt.s32.totalorder %s423_s17, %s423_s17 }
  0x87   : > { %p2574_p5 = scmp.ne.s32.totalorder %s423_s17, %s2573_s25  ;;  %p2582_p10 = scmp.lt.s32.totalorder %s2573_s25, %s2573_s25 }
  0x89   : > { %p2576_p7 = pnand %p2574_p5, %p2902_p8  ;;  %p2583_p11 = por %p2582_p10, %p2581_p4 }
  0x8b   : > { %p2577_p9 = pneg %p2576_p7 }
  0x8d   : > { %p2584_p12 = pnand %p2583_p11, %p2577_p9 }
  0x8f   : > { %2587 = shalt.err (!%p2584_p12)
}
  0x90   : > { %2195 = dma.hbm_to_vmem [thread:$0]  (!%p2886_p6), %s3270_s6, 32, %s423_s17, [#allocation9]  }
  0x91   : > { %s2767_s5 = smov [#allocation13]   ;;  %s2768_s10 = smov [#allocation14]  }
  0x92   : > { %s448_s8 = sshll.u32 %s2767_s5, 4  ;;  %s467_s11 = sshll.u32 %s2768_s10, 4  ;;  %s449_s8 = int_to_ptr.vmem [resolvable:$true] %s448_s8  ;;  %s468_s11 = int_to_ptr.vmem [resolvable:$true] %s467_s11 }
  0x93   : > { %s2588_s14 = scalar_lea.hbm %s3273_s9, 2048 }
  0x94   : > { %p2589_p1 = scmp.ne.s32.totalorder %s3273_s9, %s2588_s14  ;;  %p2595_p0 = scmp.lt.u32.totalorder %s2588_s14, %s3273_s9 }
  0x96   : > { %p2591_p3 = pnand %p2589_p1, %p2902_p8 }
  0x98   : > { %p2592_p13 = pneg %p2591_p3 }
  0x9a   : > { %p2597_p2 = pnand %p2595_p0, %p2592_p13 }
  0x9c   : > { %2600 = shalt.err (!%p2597_p2)
}
  0x9d   : > { %s2601_s17 = scalar_lea.vmem %s449_s8, 2048  ;;  %p2609_p4 = scmp.lt.s32.totalorder %s449_s8, %s449_s8 }
  0x9e   : > { %p2602_p5 = scmp.ne.s32.totalorder %s449_s8, %s2601_s17  ;;  %p2610_p10 = scmp.lt.s32.totalorder %s2601_s17, %s2601_s17 }
  0xa0   : > { %p2604_p7 = pnand %p2602_p5, %p2902_p8  ;;  %p2611_p11 = por %p2610_p10, %p2609_p4 }
  0xa2   : > { %p2605_p9 = pneg %p2604_p7 }
  0xa4   : > { %p2612_p12 = pnand %p2611_p11, %p2605_p9 }
  0xa6   : > { %2615 = shalt.err (!%p2612_p12)
}
  0xa7   : > { %2201 = dma.hbm_to_vmem [thread:$0]  (!%p2886_p6), %s3273_s9, 2048, %s449_s8, [#allocation12], %s3304_s13, %s3304_s13, %s3303_s26  }
  0xa8   : > { %s2616_s28 = scalar_lea.hbm %s3276_s12, 2048 }
  0xa9   : > { %p2617_p1 = scmp.ne.s32.totalorder %s3276_s12, %s2616_s28  ;;  %p2623_p0 = scmp.lt.u32.totalorder %s2616_s28, %s3276_s12 }
  0xab   : > { %p2619_p3 = pnand %p2617_p1, %p2902_p8 }
  0xad   : > { %p2620_p13 = pneg %p2619_p3 }
  0xaf   : > { %p2625_p2 = pnand %p2623_p0, %p2620_p13 }
  0xb1   : > { %2628 = shalt.err (!%p2625_p2)
}
  0xb2   : > { %s2629_s27 = scalar_lea.vmem %s468_s11, 2048  ;;  %p2637_p4 = scmp.lt.s32.totalorder %s468_s11, %s468_s11 }
  0xb3   : > { %p2630_p5 = scmp.ne.s32.totalorder %s468_s11, %s2629_s27  ;;  %p2638_p10 = scmp.lt.s32.totalorder %s2629_s27, %s2629_s27 }
  0xb5   : > { %p2632_p7 = pnand %p2630_p5, %p2902_p8  ;;  %p2639_p11 = por %p2638_p10, %p2637_p4 }
  0xb7   : > { %p2633_p9 = pneg %p2632_p7 }
  0xb9   : > { %p2640_p12 = pnand %p2639_p11, %p2633_p9 }
  0xbb   : > { %2643 = shalt.err (!%p2640_p12)
}
  0xbc   : > { %s3305_s26 = smov 64   ;;  %s1948_s23 = sadd.s32 4294967294, %s2756_s16  }
  0xbd   : > { %2204 = dma.hbm_to_vmem [thread:$0]  (!%p2886_p6), %s3276_s12, 2048, %s468_s11, [#allocation15], %s3305_s26, %s3305_s26, %s2764_s4  }
  0xbe   : > { %s3061_s21 = sadd.s32 1, %s2756_s16   ;;  %s41_s17 = sadd.s32 1, %s2752_s15 }
  0xbf   : > { %s38_s18 = ssub.s32 %s2756_s16, %s3061_s21  ;;  %p48_p8 = scmp.ne.s32.totalorder %s2752_s15, %s2748_s30 }
  0xc0   : > { %p39_p1 = scmp.eq.s32.totalorder %s38_s18, 0  ;;  %p49_p3 = scmp.eq.s32.totalorder %s2756_s16, 0 }
  0xc1   : > { %p54_p13 = scmp.ne.s32.totalorder %s2748_s30, %s2744_s29  ;;  %p351_p0 = scmp.eq.s32.totalorder %s2870_s19, 1 }
  0xc2   : > { %s3073_s1 = scalar_select %p39_p1, %s2752_s15, %s41_s17  }
  0xc3   : > { %p50_p2 = por %p49_p3, %p48_p8  ;;  %p3306_p5 = scmp.eq.s32.totalorder %s2870_s19, 0 }
  0xc4   : > { %p3081_p6 = por %p351_p0, %p48_p8  ;;  %p357_p9 = scmp.eq.s32.totalorder %s1948_s23, 1 }
  0xc5   : > { %p3077_p7 = por %p3306_p5, %p54_p13  ;;  %p2220_p4 = scmp.lt.s32.totalorder %s2756_s16, 2 }
  0xc6   : > { %s3308_s11 = scalar_select %p3081_p6, 1, 0 }
  0xc7   : > { %s484_s10 = sand.u32 1, %s2752_s15   ;;  %p3087_p10 = por %p357_p9, %p54_p13 }
  0xc8   : > { %s1958_s24 = sshll.u32 %s484_s10, 3  ;;  %s2101_s14 = sshll.u32 %s2756_s16, 7 }
  0xc9   : > { %s3309_s28 = scalar_select %p3087_p10, 1, 0 }
  0xca   : > { %s3095_s27 = scalar_lea.hbm %s3264_s0, %s2101_s14  ;;  %s488_s13 = scalar_lea.vmem [#allocation2], %s1958_s24 }
  0xcb   : > { %s495_s8 = sshll.u32 %s488_s13, 4  ;;  %p3097_p11 = pnand %p2220_p4, %p50_p2  ;;  %s3101_s8 = int_to_ptr.vmem [resolvable:$true] %s495_s8 }
  0xcc   : > { %s3103_s17 = scalar_lea.sflag [#allocation3], %s484_s10  ;;  %s2644_s18 = scalar_lea.hbm %s3095_s27, 128 }
  0xcd   : > { %p2645_p12 = scmp.ne.s32.totalorder %s3095_s27, %s2644_s18  ;;  %p2646_p8 = pneg %p3097_p11 }
  0xce   : > { %s2649_s22 = scalar_lea.hbm %s3264_s0, 256  ;;  %p2650_p13 = scmp.lt.u32.totalorder %s3095_s27, %s3264_s0 }
  0xcf   : > { %p2647_p1 = pnand %p2646_p8, %p2645_p12  ;;  %p2651_p0 = scmp.lt.u32.totalorder %s2649_s22, %s2644_s18 }
  0xd0   : > { %p2653_p5 = scmp.lt.u32.totalorder %s2644_s18, %s3095_s27 }
  0xd1   : > { %p2648_p3 = pneg %p2647_p1  ;;  %p2652_p2 = por %p2651_p0, %p2650_p13 }
  0xd3   : > { %p2654_p9 = por %p2653_p5, %p2652_p2 }
  0xd5   : > { %p2655_p4 = pnand %p2654_p9, %p2648_p3 }
  0xd7   : > { %2658 = shalt.err (!%p2655_p4)
}
  0xd8   : > { %s2659_s10 = scalar_lea.vmem %s3101_s8, 128  ;;  %s2769_s24 = smov [#allocation2]  }
  0xd9   : > { %p2660_p12 = scmp.ne.s32.totalorder %s3101_s8, %s2659_s10  ;;  %s2664_s14 = sshll.u32 %s2769_s24, 4  ;;  %s2665_s14 = int_to_ptr.vmem [resolvable:$false] %s2664_s14 }
  0xda   : > { %s2666_s25 = scalar_lea.vmem %s2665_s14, 256  ;;  %p2667_p6 = scmp.lt.s32.totalorder %s3101_s8, %s2665_s14 }
  0xdb   : > { %p2662_p1 = pnand %p2660_p12, %p2646_p8  ;;  %p2668_p13 = scmp.lt.s32.totalorder %s2666_s25, %s2659_s10 }
  0xdd   : > { %p2663_p10 = pneg %p2662_p1  ;;  %p2669_p0 = por %p2668_p13, %p2667_p6 }
  0xdf   : > { %p2670_p2 = pnand %p2669_p0, %p2663_p10 }
  0xe1   : > { %2673 = shalt.err (!%p2670_p2)
}
  0xe2   : > { %2208 = dma.hbm_to_vmem [thread:$0]  (!%p3097_p11), %s3095_s27, 128, %s3101_s8, %s3103_s17, %s3305_s26, %s3305_s26, %s2764_s4  }
  0xe3   : > { %p3311_p8 = scmp.ne.s32.totalorder %s3298_s20, 0 }
  0xe4   : > { %s3137_s18 = sand.u32 (!%p3311_p8), 1, %s2748_s30  }
  0xe5   : > { %507 = sbr.rel (%p3311_p8) target bundleno = 1918 (0x77e), region = 76  ;;  %s1962_s22 = sshll.u32 (!%p3311_p8), %s3137_s18, 3 }
  0xe6   : > { %s510_s13 = scalar_lea.sflag (!%p3311_p8), [#allocation3], %s3137_s18  ;;  %s513_s10 = scalar_lea.vmem (!%p3311_p8), [#allocation2], %s1962_s22 }
  0xec   : > { %2719 = dma.done.wait (%p3077_p7), %s510_s13, 128  }
  0xed   : > { %2721 = vsyncadd (%p3077_p7), %s510_s13, 4294967168  ;;  %p3312_p6 = scmp.eq.s32.totalorder %s2870_s19, 0 }
  0xef   : > { %2723 = dma.done.wait (%p3312_p6), [#allocation6], 4608   ;;  %p3313_p10 = pmov %p3312_p6 }
  0xf0   : > { %p3314_p11 = pmov %p3312_p6 }
  0xf1   : > { %2725 = vsyncadd (%p3313_p10), [#allocation6], 4294962688 }
  0xf2   : > { %2727 = dma.done.wait (%p3314_p11), [#allocation9], 4128   ;;  %p3315_p3 = pmov %p3312_p6 }
  0xf4   : > { %2729 = vsyncadd (%p3315_p3), [#allocation9], 4294963168  ;;  %p3316_p5 = pmov %p3315_p3 }
  0xf5   : > { %p3317_p9 = pmov %p3315_p3 }
  0xf6   : > { %2731 = dma.done.wait (%p3316_p5), [#allocation12], 4096  }
  0xf7   : > { %2733 = vsyncadd (%p3317_p9), [#allocation12], 4294963200  ;;  %p3318_p7 = pmov %p3315_p3 }
  0xf8   : > { %p3319_p4 = pmov %p3315_p3 }
  0xf9   : > { %2735 = dma.done.wait (%p3318_p7), [#allocation15], 2048  }
  0xfa   : > { %2737 = vsyncadd (%p3319_p4), [#allocation15], 4294965248  ;;  %v2770_v0 = vmov 0   ;;  %v2275_v1 = vld [vmem:[#allocation5 + $0x4] ss:$8 sps:$4 sm:$0xff]   ;;  %v3162_v8 = vld [vmem:[%s513_s10] sm:$0xff]  }
  0xfb   : > { %668 = vmatprep.mubr.bf16.mxu0 %v2770_v0  ;;  %v2277_v2 = vld [vmem:[#allocation5] ss:$8 sps:$4 sm:$0xff]   ;;  %636 = vmatprep.subr.bf16.mxu0 %v2275_v1  ;;  %v2278_v3 = vld [vmem:[#allocation5 + $0x14] ss:$8 sps:$4 sm:$0xff]   ;;  %v2280_v4 = vld [vmem:[#allocation5 + $0x10] ss:$8 sps:$4 sm:$0xff]  }
  0xfc   : > { %637 = vmatpush1.bf16.msra.mxu0 %v2277_v2  ;;  %v2282_v5 = vld [vmem:[#allocation7 + $0x4] ss:$8 sps:$4 sm:$0xff]   ;;  %v2284_v6 = vld [vmem:[#allocation7] ss:$8 sps:$4 sm:$0xff]   ;;  %v2285_v7 = vld [vmem:[#allocation7 + $0x14] ss:$8 sps:$4 sm:$0xff]  }
  0xfd   : > { %638 = vmatprep.subr.bf16.mxu0 %v2278_v3  ;;  %889 = vmatprep.subr.bf16.mxu1 %v2282_v5  ;;  %vm632_vm0 = vcmask 261120   ;;  %v2287_v9 = vld [vmem:[#allocation7 + $0x10] ss:$8 sps:$4 sm:$0xff]   ;;  %v2288_v10 = vld [vmem:[#allocation7 + $0x24] ss:$8 sps:$4 sm:$0xff]   ;;  %v597_v3 = vlaneseq  ;;  %s3320_s27 = sld [smem:[#allocation24_spill]] }
  0xfe   : > { %890 = vmatpush1.bf16.msra.mxu1 %v2284_v6  ;;  %v2290_v11 = vld [vmem:[#allocation7 + $0x20] ss:$8 sps:$4 sm:$0xff]   ;;  %v2291_v12 = vld [vmem:[#allocation7 + $0x34] ss:$8 sps:$4 sm:$0xff]   ;;  %v2293_v13 = vld [vmem:[#allocation7 + $0x30] ss:$8 sps:$4 sm:$0xff]  }
  0xff   : > { %891 = vmatprep.subr.bf16.mxu1 %v2285_v7  ;;  %v2294_v14 = vld [vmem:[#allocation7 + $0x44] ss:$8 sps:$4 sm:$0xff]   ;;  %v2296_v15 = vld [vmem:[#allocation7 + $0x40] ss:$8 sps:$4 sm:$0xff]   ;;  %v2297_v16 = vld [vmem:[#allocation7 + $0x54] ss:$8 sps:$4 sm:$0xff]  }
 0x100   : > { %639 = vmatpush1.bf16.msra.mxu0 %v2280_v4  ;;  %v2299_v17 = vld [vmem:[#allocation7 + $0x50] ss:$8 sps:$4 sm:$0xff]   ;;  %v2300_v18 = vld [vmem:[#allocation7 + $0x64] ss:$8 sps:$4 sm:$0xff]   ;;  %v2302_v19 = vld [vmem:[#allocation7 + $0x60] ss:$8 sps:$4 sm:$0xff]  }
 0x101   : > { %v2303_v20 = vld [vmem:[#allocation7 + $0x74] ss:$8 sps:$4 sm:$0xff]   ;;  %v2305_v21 = vld [vmem:[#allocation7 + $0x70] ss:$8 sps:$4 sm:$0xff]   ;;  %v2306_v22 = vld [vmem:[#allocation7 + $0x84] ss:$8 sps:$4 sm:$0xff]  }
 0x102   : > { %892 = vmatpush1.bf16.msra.mxu1 %v2287_v9  ;;  %v2308_v23 = vld [vmem:[#allocation7 + $0x80] ss:$8 sps:$4 sm:$0xff]   ;;  %v2309_v24 = vld [vmem:[#allocation7 + $0x94] ss:$8 sps:$4 sm:$0xff]   ;;  %v2311_v25 = vld [vmem:[#allocation7 + $0x90] ss:$8 sps:$4 sm:$0xff]  }
 0x103   : > { %1976 = vmatmul.mubr.msk.bf16.vlgmr.msra.gmra.mrb[0].mxu0 %vm632_vm0, %v3162_v8  ;;  %893 = vmatprep.subr.bf16.mxu1 %v2288_v10  ;;  %v2312_v26 = vld [vmem:[#allocation7 + $0xa4] ss:$8 sps:$4 sm:$0xff]   ;;  %v2314_v27 = vld [vmem:[#allocation7 + $0xa0] ss:$8 sps:$4 sm:$0xff]   ;;  %v2315_v28 = vld [vmem:[#allocation7 + $0xb4] ss:$8 sps:$4 sm:$0xff]  }
 0x104   : > { %v2317_v29 = vld [vmem:[#allocation7 + $0xb0] ss:$8 sps:$4 sm:$0xff]   ;;  %v2318_v30 = vld [vmem:[#allocation7 + $0xc4] ss:$8 sps:$4 sm:$0xff]   ;;  %v2320_v31 = vld [vmem:[#allocation7 + $0xc0] ss:$8 sps:$4 sm:$0xff]  }
 0x105   : > { %v2321_v32 = vld [vmem:[#allocation7 + $0xd4] ss:$8 sps:$4 sm:$0xff]   ;;  %v2323_v33 = vld [vmem:[#allocation7 + $0xd0] ss:$8 sps:$4 sm:$0xff]   ;;  %v2324_v34 = vld [vmem:[#allocation7 + $0xe4] ss:$8 sps:$4 sm:$0xff]  }
 0x106   : > { %894 = vmatpush1.bf16.msra.mxu1 %v2290_v11  ;;  %v2326_v35 = vld [vmem:[#allocation7 + $0xe0] ss:$8 sps:$4 sm:$0xff]   ;;  %v2327_v36 = vld [vmem:[#allocation7 + $0xf4] ss:$8 sps:$4 sm:$0xff]   ;;  %v2329_v37 = vld [vmem:[#allocation7 + $0xf0] ss:$8 sps:$4 sm:$0xff]  }
 0x107   : > { %895 = vmatprep.subr.bf16.mxu1 %v2291_v12  ;;  %v2330_v38 = vld [vmem:[#allocation8] ss:$8 sps:$4 sm:$0xff]   ;;  %v2332_v39 = vld [vmem:[#allocation8 + $0x4] ss:$8 sps:$4 sm:$0xff]   ;;  %v2335_v40 = vld [vmem:[#allocation8 + $0x14] ss:$8 sps:$4 sm:$0xff]  }
 0x108   : > { %1142 = vmatprep.subr.bf16.mxu0 %v2332_v39  ;;  %v2333_v41 = vld [vmem:[#allocation8 + $0x10] ss:$8 sps:$4 sm:$0xff]   ;;  %v2338_v42 = vld [vmem:[#allocation8 + $0x24] ss:$8 sps:$4 sm:$0xff]   ;;  %v2336_v43 = vld [vmem:[#allocation8 + $0x20] ss:$8 sps:$4 sm:$0xff]  }
 0x109   : > { %1143 = vmatpush1.bf16.msra.mxu0 %v2330_v38  ;;  %v2341_v44 = vld [vmem:[#allocation8 + $0x34] ss:$8 sps:$4 sm:$0xff]   ;;  %v2339_v45 = vld [vmem:[#allocation8 + $0x30] ss:$8 sps:$4 sm:$0xff]   ;;  %v2344_v46 = vld [vmem:[#allocation8 + $0x44] ss:$8 sps:$4 sm:$0xff]  }
 0x10a   : > { %896 = vmatpush1.bf16.msra.mxu1 %v2293_v13  ;;  %1144 = vmatprep.subr.bf16.mxu0 %v2335_v40  ;;  %v2342_v47 = vld [vmem:[#allocation8 + $0x40] ss:$8 sps:$4 sm:$0xff]   ;;  %v2347_v48 = vld [vmem:[#allocation8 + $0x54] ss:$8 sps:$4 sm:$0xff]   ;;  %v2345_v49 = vld [vmem:[#allocation8 + $0x50] ss:$8 sps:$4 sm:$0xff]  }
 0x10b   : > { %897 = vmatprep.subr.bf16.mxu1 %v2294_v14  ;;  %v2350_v50 = vld [vmem:[#allocation8 + $0x64] ss:$8 sps:$4 sm:$0xff]   ;;  %v2348_v51 = vld [vmem:[#allocation8 + $0x60] ss:$8 sps:$4 sm:$0xff]   ;;  %v2353_v52 = vld [vmem:[#allocation8 + $0x74] ss:$8 sps:$4 sm:$0xff]  }
 0x10c   : > { %v2351_v53 = vld [vmem:[#allocation8 + $0x70] ss:$8 sps:$4 sm:$0xff]   ;;  %v2356_v54 = vld [vmem:[#allocation8 + $0x84] ss:$8 sps:$4 sm:$0xff]   ;;  %v2354_v55 = vld [vmem:[#allocation8 + $0x80] ss:$8 sps:$4 sm:$0xff]  }
 0x10d   : > { %1145 = vmatpush1.bf16.msra.mxu0 %v2333_v41  ;;  %v2359_v56 = vld [vmem:[#allocation8 + $0x94] ss:$8 sps:$4 sm:$0xff]   ;;  %v2357_v57 = vld [vmem:[#allocation8 + $0x90] ss:$8 sps:$4 sm:$0xff]   ;;  %v2362_v58 = vld [vmem:[#allocation8 + $0xa4] ss:$8 sps:$4 sm:$0xff]  }
 0x10e   : > { %898 = vmatpush1.bf16.msra.mxu1 %v2296_v15  ;;  %1146 = vmatprep.subr.bf16.mxu0 %v2338_v42  ;;  %v2360_v59 = vld [vmem:[#allocation8 + $0xa0] ss:$8 sps:$4 sm:$0xff]   ;;  %v2365_v60 = vld [vmem:[#allocation8 + $0xb4] ss:$8 sps:$4 sm:$0xff]   ;;  %v2363_v61 = vld [vmem:[#allocation8 + $0xb0] ss:$8 sps:$4 sm:$0xff]  }
 0x10f   : > { %899 = vmatprep.subr.bf16.mxu1 %v2297_v16  ;;  %v2368_v62 = vld [vmem:[#allocation8 + $0xc4] ss:$8 sps:$4 sm:$0xff]   ;;  %v2366_v63 = vld [vmem:[#allocation8 + $0xc0] ss:$8 sps:$4 sm:$0xff]   ;;  %v2371_v1 = vld [vmem:[#allocation8 + $0xd4] ss:$8 sps:$4 sm:$0xff]  }
 0x110   : > { %v2369_v2 = vld [vmem:[#allocation8 + $0xd0] ss:$8 sps:$4 sm:$0xff]   ;;  %v598_v4 = vshrl.u32 %v597_v3, 7  ;;  %v2387_v38 = vld [vmem:[#allocation11 + $0x20] sm:$0xff]   ;;  %s3321_s17 = sld [smem:[#allocation26_spill]]  ;;  %s3322_s25 = sld [smem:[#allocation27_spill]] }
 0x111   : > { %1147 = vmatpush1.bf16.msra.mxu0 %v2336_v43  ;;  %v595_v6 = vld [vmem:[%s3266_s2] sm:$0x3]  ;;  %s3323_s8 = sld [smem:[#allocation28_spill]]  ;;  %s1970_s23 = sshll.u32 %s3137_s18, 4 }
 0x112   : > { %900 = vmatpush1.bf16.msra.mxu1 %v2299_v17  ;;  %1148 = vmatprep.subr.bf16.mxu0 %v2341_v44  ;;  %v3166_v5 = vsub.s32 0, %v598_v4  ;;  %v3171_v7 = vsub.s32 1, %v598_v4  ;;  %v2388_v39 = vld [vmem:[#allocation11 + $0x68] sm:$0xff]   ;;  %s3324_s14 = sld [smem:[#allocation29_spill]]  ;;  %s585_s22 = scalar_lea.vmem [#allocation16], %s1970_s23 }
 0x113   : > { %901 = vmatprep.subr.bf16.mxu1 %v2300_v18  ;;  %v717_v40 = vld [vmem:[%s3320_s27] sm:$0x3]  ;;  %s1808_s13 = sshll.u32 %s585_s22, 4  ;;  %s2102_s10 = sshll.u32 %s2870_s19, 8  ;;  %s3215_s13 = int_to_ptr.vmem [resolvable:$true] %s1808_s13 }
 0x114   : > { %v600_v9 = vrot.slane %v595_v6, %v3166_v5  ;;  %v604_v10 = vrot.slane %v595_v6, %v3171_v7  ;;  %v722_v41 = vrot.slane %v717_v40, %v3166_v5  ;;  %v726_v42 = vrot.slane %v717_v40, %v3171_v7  ;;  %s3325_s26 = sld [smem:[#allocation30_spill]]  ;;  %s1795_s27 = scalar_lea.sflag [#allocation4], %s3137_s18 }
 0x115   : > { %1149 = vmatpush1.bf16.msra.mxu0 %v2339_v45  ;;  %p3326_p1 = scmp.ne.s32.totalorder %s3308_s11, 0  ;;  %s2771_s19 = smov [#allocation16]  }
 0x116   : > { %902 = vmatpush1.bf16.msra.mxu1 %v2302_v19  ;;  %1150 = vmatprep.subr.bf16.mxu0 %v2344_v46  ;;  %s2678_s23 = sshll.u32 %s2771_s19, 4  ;;  %s2679_s23 = int_to_ptr.vmem [resolvable:$false] %s2678_s23 }
 0x117   : > { %903 = vmatprep.subr.bf16.mxu1 %v2303_v20  ;;  %p2681_p2 = scmp.lt.s32.totalorder %s3215_s13, %s2679_s23 }
 0x119   : > { %1151 = vmatpush1.bf16.msra.mxu0 %v2342_v47 }
 0x11a   : > { %904 = vmatpush1.bf16.msra.mxu1 %v2305_v21  ;;  %1152 = vmatprep.subr.bf16.mxu0 %v2347_v48  ;;  %s3220_s5 = scalar_lea.hbm %s3325_s26, %s2102_s10 }
 0x11b   : > { %905 = vmatprep.subr.bf16.mxu1 %v2306_v22 }
 0x11d   : > { %1153 = vmatpush1.bf16.msra.mxu0 %v2345_v49 }
 0x11e   : > { %906 = vmatpush1.bf16.msra.mxu1 %v2308_v23  ;;  %1154 = vmatprep.subr.bf16.mxu0 %v2350_v50 }
 0x11f   : > { %907 = vmatprep.subr.bf16.mxu1 %v2309_v24 }
 0x121   : > { %1155 = vmatpush1.bf16.msra.mxu0 %v2348_v51 }
 0x122   : > { %908 = vmatpush1.bf16.msra.mxu1 %v2311_v25  ;;  %1156 = vmatprep.subr.bf16.mxu0 %v2353_v52  ;;  %v2374_v25 = vld [vmem:[#allocation8 + $0xe4] ss:$8 sps:$4 sm:$0xff]  }
 0x123   : > { %909 = vmatprep.subr.bf16.mxu1 %v2312_v26  ;;  %v2372_v26 = vld [vmem:[#allocation8 + $0xe0] ss:$8 sps:$4 sm:$0xff]  }
 0x125   : > { %1157 = vmatpush1.bf16.msra.mxu0 %v2351_v53 }
 0x126   : > { %910 = vmatpush1.bf16.msra.mxu1 %v2314_v27  ;;  %1158 = vmatprep.subr.bf16.mxu0 %v2356_v54  ;;  %v2377_v27 = vld [vmem:[#allocation8 + $0xf4] ss:$8 sps:$4 sm:$0xff]  }
 0x127   : > { %911 = vmatprep.subr.bf16.mxu1 %v2315_v28  ;;  %v2375_v28 = vld [vmem:[#allocation8 + $0xf0] ss:$8 sps:$4 sm:$0xff]  }
 0x129   : > { %1159 = vmatpush1.bf16.msra.mxu0 %v2354_v55 }
 0x12a   : > { %912 = vmatpush1.bf16.msra.mxu1 %v2317_v29  ;;  %1160 = vmatprep.subr.bf16.mxu0 %v2359_v56  ;;  %v2378_v29 = vld [vmem:[#allocation11 + $0x40] sm:$0xff]  }
 0x12b   : > { %913 = vmatprep.subr.bf16.mxu1 %v2318_v30  ;;  %v2379_v30 = vld [vmem:[#allocation11] sm:$0xff]  }
 0x12d   : > { %1161 = vmatpush1.bf16.msra.mxu0 %v2357_v57  ;;  %v2389_v57 = vld [vmem:[#allocation11 + $0x28] sm:$0xff]  }
 0x12e   : > { %914 = vmatpush1.bf16.msra.mxu1 %v2320_v31  ;;  %1162 = vmatprep.subr.bf16.mxu0 %v2362_v58  ;;  %v2380_v31 = vld [vmem:[#allocation11 + $0x48] sm:$0xff]   ;;  %v2390_v58 = vld [vmem:[#allocation11 + $0x70] sm:$0xff]  }
 0x12f   : > { %915 = vmatprep.subr.bf16.mxu1 %v2321_v32  ;;  %v2381_v32 = vld [vmem:[#allocation11 + $0x8] sm:$0xff]  }
 0x131   : > { %1163 = vmatpush1.bf16.msra.mxu0 %v2360_v59  ;;  %v2391_v59 = vld [vmem:[#allocation11 + $0x30] sm:$0xff]  }
 0x132   : > { %916 = vmatpush1.bf16.msra.mxu1 %v2323_v33  ;;  %1164 = vmatprep.subr.bf16.mxu0 %v2365_v60  ;;  %v2382_v33 = vld [vmem:[#allocation11 + $0x50] sm:$0xff]   ;;  %v2392_v60 = vld [vmem:[#allocation11 + $0x78] sm:$0xff]  }
 0x133   : > { %917 = vmatprep.subr.bf16.mxu1 %v2324_v34  ;;  %v2383_v34 = vld [vmem:[#allocation11 + $0x10] sm:$0xff]  }
 0x135   : > { %1165 = vmatpush1.bf16.msra.mxu0 %v2363_v61  ;;  %v2393_v61 = vld [vmem:[#allocation11 + $0x38] sm:$0xff]  }
 0x136   : > { %918 = vmatpush1.bf16.msra.mxu1 %v2326_v35  ;;  %1166 = vmatprep.subr.bf16.mxu0 %v2368_v62  ;;  %v2384_v35 = vld [vmem:[#allocation11 + $0x58] sm:$0xff]  }
 0x137   : > { %919 = vmatprep.subr.bf16.mxu1 %v2327_v36  ;;  %v2385_v36 = vld [vmem:[#allocation11 + $0x18] sm:$0xff]  }
 0x138   : > { %v970_v62 = vld [vmem:[#allocation10] sm:$0x3] }
 0x139   : > { %1167 = vmatpush1.bf16.msra.mxu0 %v2366_v63  ;;  %v975_v63 = vrot.slane %v970_v62, %v3166_v5 }
 0x13a   : > { %920 = vmatpush1.bf16.msra.mxu1 %v2329_v37  ;;  %1168 = vmatprep.subr.bf16.mxu0 %v2371_v1  ;;  %v2386_v37 = vld [vmem:[#allocation11 + $0x60] sm:$0xff]   ;;  %v979_v1 = vrot.slane %v970_v62, %v3171_v7 }
 0x13b   : > { %2103 = vmatprep.subr.bf16.mxu1 %v2378_v29  ;;  %v2396_v29 = vld [vmem:[%s3322_s25 + $0x4] ss:$8 sps:$4 sm:$0xff]   ;;  %v2432_v62 = vld [vmem:[#allocation14 + $0x60] sm:$0xff]  }
 0x13d   : > { %1169 = vmatpush1.bf16.msra.mxu0 %v2369_v2 }
 0x13e   : > { %1170 = vmatprep.subr.bf16.mxu0 %v2374_v25 }
 0x141   : > { %1171 = vmatpush1.bf16.msra.mxu0 %v2372_v26 }
 0x142   : > { %1172 = vmatprep.subr.bf16.mxu0 %v2377_v27 }
 0x145   : > { %1173 = vmatpush1.bf16.msra.mxu0 %v2375_v28  ;;  %v2394_v28 = vld [vmem:[%s3322_s25] ss:$8 sps:$4 sm:$0xff]  }
 0x146   : > { %1428 = vmatprep.subr.bf16.mxu0 %v2396_v29 }
 0x1d6   : > { %v670_v11 = vpop.f32.mrb[0].mxu0 }
 0x1d7   : > { %v671_v12 = vadd.f32 %v670_v11, %v600_v9  ;;  %v672_v13 = vpop.f32.mrb[1].mxu0 }
 0x1d8   : > { %v673_v14 = vadd.f32 %v672_v13, %v604_v10  ;;  %v674_v15 = vpop.f32.mrb[2].mxu0 }
 0x1d9   : > { %v675_v16 = vadd.f32 %v674_v15, %v600_v9  ;;  %v676_v17 = vpop.f32.mrb[3].mxu0  ;;  %v679_v19 = vmax.f32 %v671_v12, 0.0 }
 0x1da   : > { %v677_v18 = vadd.f32 %v676_v17, %v604_v10  ;;  %v680_v21 = vmax.f32 %v673_v14, 0.0 }
 0x1db   : > { %v681_v20 = vmax.f32 %v675_v16, 0.0 }
 0x1dc   : > { %v682_v22 = vmax.f32 %v677_v18, 0.0 }
 0x1dd   : > { %v683_v23 = vpack.c.bf16 %v681_v20, %v679_v19 }
 0x1de   : > { %v684_v24 = vpack.c.bf16 %v682_v22, %v680_v21  ;;  %v2041_v21 = vld [vmem:[%s3321_s17] ss:$0 sm:$0xff]  ;;  %s2680_s17 = scalar_lea.vmem %s2679_s23, 512 }
 0x1e0   : > { %921 = vmatprep.mubr.bf16.mxu1 %v684_v24 }
 0x1e1   : > { %922 = vmatmul.mubr.bf16.vlgmr.msra.gmra.mrb[0].mxu1 %v683_v23 }
 0x1e2   : > { %2104 = vmatpush3.bf16.msra.mxu1 %v2379_v30  ;;  %v2399_v30 = vld [vmem:[%s3322_s25 + $0x14] ss:$8 sps:$4 sm:$0xff]  }
 0x1e3   : > { %2105 = vmatprep.subr.bf16.mxu1 %v2380_v31  ;;  %v2397_v31 = vld [vmem:[%s3322_s25 + $0x10] ss:$8 sps:$4 sm:$0xff]  }
 0x1e6   : > { %2106 = vmatpush3.bf16.msra.mxu1 %v2381_v32  ;;  %v2402_v32 = vld [vmem:[#allocation13 + $0x4] ss:$8 sps:$4 sm:$0xff]  }
 0x1e7   : > { %2107 = vmatprep.subr.bf16.mxu1 %v2382_v33  ;;  %v2400_v33 = vld [vmem:[#allocation13] ss:$8 sps:$4 sm:$0xff]  }
 0x1ea   : > { %2108 = vmatpush3.bf16.msra.mxu1 %v2383_v34  ;;  %v2405_v34 = vld [vmem:[#allocation13 + $0x14] ss:$8 sps:$4 sm:$0xff]  }
 0x1eb   : > { %2109 = vmatprep.subr.bf16.mxu1 %v2384_v35  ;;  %v2403_v35 = vld [vmem:[#allocation13 + $0x10] ss:$8 sps:$4 sm:$0xff]  }
 0x1ee   : > { %2110 = vmatpush3.bf16.msra.mxu1 %v2385_v36  ;;  %v2408_v36 = vld [vmem:[#allocation13 + $0x24] ss:$8 sps:$4 sm:$0xff]  }
 0x1ef   : > { %2111 = vmatprep.subr.bf16.mxu1 %v2386_v37  ;;  %v2406_v37 = vld [vmem:[#allocation13 + $0x20] ss:$8 sps:$4 sm:$0xff]  }
 0x1f2   : > { %2112 = vmatpush3.bf16.msra.mxu1 %v2387_v38 }
 0x1f3   : > { %2113 = vmatprep.subr.bf16.mxu1 %v2388_v39 }
 0x1f6   : > { %2114 = vmatpush3.bf16.msra.mxu1 %v2389_v57  ;;  %v2427_v57 = vld [vmem:[#allocation14 + $0x8] sm:$0xff]  }
 0x1f7   : > { %2115 = vmatprep.subr.bf16.mxu1 %v2390_v58  ;;  %v2428_v58 = vld [vmem:[#allocation14 + $0x50] sm:$0xff]  }
 0x1fa   : > { %2116 = vmatpush3.bf16.msra.mxu1 %v2391_v59  ;;  %v2429_v59 = vld [vmem:[#allocation14 + $0x10] sm:$0xff]  }
 0x1fb   : > { %2117 = vmatprep.subr.bf16.mxu1 %v2392_v60  ;;  %v2430_v60 = vld [vmem:[#allocation14 + $0x58] sm:$0xff]  }
 0x1fe   : > { %2118 = vmatpush3.bf16.msra.mxu1 %v2393_v61  ;;  %v2431_v61 = vld [vmem:[#allocation14 + $0x18] sm:$0xff]  }
 0x2b4   : > { %v923_v43 = vpop.f32.mrb[0].mxu1 }
 0x2b5   : > { %v924_v44 = vadd.f32 %v923_v43, %v722_v41  ;;  %v925_v45 = vpop.f32.mrb[1].mxu1 }
 0x2b6   : > { %v926_v46 = vadd.f32 %v925_v45, %v726_v42  ;;  %v927_v47 = vpop.f32.mrb[2].mxu1  ;;  %v2409_v45 = vld [vmem:[#allocation13 + $0x30] ss:$8 sps:$4 sm:$0xff]  }
 0x2b7   : > { %v928_v48 = vadd.f32 %v927_v47, %v722_v41  ;;  %v929_v49 = vpop.f32.mrb[3].mxu1  ;;  %v932_v51 = vmax.f32 %v924_v44, 0.0  ;;  %v2412_v47 = vld [vmem:[#allocation13 + $0x40] ss:$8 sps:$4 sm:$0xff]  }
 0x2b8   : > { %v930_v50 = vadd.f32 %v929_v49, %v726_v42  ;;  %v933_v53 = vmax.f32 %v926_v46, 0.0  ;;  %v2414_v46 = vld [vmem:[#allocation13 + $0x44] ss:$8 sps:$4 sm:$0xff]   ;;  %v2415_v49 = vld [vmem:[#allocation13 + $0x50] ss:$8 sps:$4 sm:$0xff]  }
 0x2b9   : > { %v934_v52 = vmax.f32 %v928_v48, 0.0  ;;  %v2417_v48 = vld [vmem:[#allocation13 + $0x54] ss:$8 sps:$4 sm:$0xff]  }
 0x2ba   : > { %v935_v54 = vmax.f32 %v930_v50, 0.0  ;;  %v2420_v50 = vld [vmem:[#allocation13 + $0x64] ss:$8 sps:$4 sm:$0xff]  }
 0x2bb   : > { %v936_v55 = vpack.c.bf16 %v934_v52, %v932_v51  ;;  %v2418_v51 = vld [vmem:[#allocation13 + $0x60] ss:$8 sps:$4 sm:$0xff]   ;;  %v2423_v52 = vld [vmem:[#allocation13 + $0x74] ss:$8 sps:$4 sm:$0xff]  }
 0x2bc   : > { %v937_v56 = vpack.c.bf16 %v935_v54, %v933_v53  ;;  %v2421_v53 = vld [vmem:[#allocation13 + $0x70] ss:$8 sps:$4 sm:$0xff]   ;;  %v2424_v54 = vld [vmem:[#allocation14 + $0x40] sm:$0xff]  }
 0x2bd   : > { %2125 = vmatprep.subr.bf16.mxu1 %v2424_v54 }
 0x2be   : > { %1174 = vmatprep.mubr.bf16.mxu0 %v937_v56  ;;  %v2426_v56 = vld [vmem:[#allocation14 + $0x48] sm:$0xff]  }
 0x2bf   : > { %1175 = vmatmul.mubr.bf16.vlgmr.msra.gmra.mrb[4].mxu0 %v936_v55  ;;  %v2425_v55 = vld [vmem:[#allocation14] sm:$0xff]  }
 0x2c0   : > { %1460 = vmatprep.mubr.bf16.mxu0 %v2770_v0  ;;  %1429 = vmatpush1.bf16.msra.mxu0 %v2394_v28 }
 0x2c1   : > { %1430 = vmatprep.subr.bf16.mxu0 %v2399_v30 }
 0x2c4   : > { %1431 = vmatpush1.bf16.msra.mxu0 %v2397_v31 }
 0x2c5   : > { %1551 = vmatprep.subr.bf16.mxu0 %v2402_v32 }
 0x2c7   : > { %2062 = vmatmul.mubr.msk.bf16.vlgmr.msra.gmra.mrb[8].mxu0 %vm632_vm0, %v3162_v8 }
 0x2c8   : > { %1552 = vmatpush1.bf16.msra.mxu0 %v2400_v33  ;;  %1583 = vmatprep.mubr.bf16.mxu0 %v2770_v0  ;;  %v2411_v0 = vld [vmem:[#allocation13 + $0x34] ss:$8 sps:$4 sm:$0xff]  }
 0x2c9   : > { %1553 = vmatprep.subr.bf16.mxu0 %v2405_v34 }
 0x2cc   : > { %1554 = vmatpush1.bf16.msra.mxu0 %v2403_v35 }
 0x2cd   : > { %1555 = vmatprep.subr.bf16.mxu0 %v2408_v36 }
 0x2d0   : > { %1556 = vmatpush1.bf16.msra.mxu0 %v2406_v37 }
 0x2d1   : > { %1557 = vmatprep.subr.bf16.mxu0 %v2411_v0 }
 0x2d4   : > { %1558 = vmatpush1.bf16.msra.mxu0 %v2409_v45 }
 0x2d5   : > { %1559 = vmatprep.subr.bf16.mxu0 %v2414_v46 }
 0x2d8   : > { %1560 = vmatpush1.bf16.msra.mxu0 %v2412_v47 }
 0x2d9   : > { %1561 = vmatprep.subr.bf16.mxu0 %v2417_v48 }
 0x2dc   : > { %1562 = vmatpush1.bf16.msra.mxu0 %v2415_v49 }
 0x2dd   : > { %1563 = vmatprep.subr.bf16.mxu0 %v2420_v50 }
 0x2e0   : > { %1564 = vmatpush1.bf16.msra.mxu0 %v2418_v51 }
 0x2e1   : > { %1565 = vmatprep.subr.bf16.mxu0 %v2423_v52 }
 0x2e4   : > { %1566 = vmatpush1.bf16.msra.mxu0 %v2421_v53 }
 0x392   : > { %v1176_v2 = vpop.f32.mrb[4].mxu0 }
 0x393   : > { %v1177_v3 = vadd.f32 %v1176_v2, %v975_v63  ;;  %v1178_v4 = vpop.f32.mrb[5].mxu0 }
 0x394   : > { %v1179_v6 = vadd.f32 %v1178_v4, %v979_v1  ;;  %v1180_v9 = vpop.f32.mrb[6].mxu0 }
 0x395   : > { %v1181_v10 = vadd.f32 %v1180_v9, %v975_v63  ;;  %v1182_v11 = vpop.f32.mrb[7].mxu0  ;;  %v1185_v13 = vmax.f32 %v1177_v3, 0.0  ;;  %v2433_v63 = vld [vmem:[#allocation14 + $0x20] sm:$0xff]  }
 0x396   : > { %v1183_v12 = vadd.f32 %v1182_v11, %v979_v1  ;;  %v1186_v15 = vmax.f32 %v1179_v6, 0.0  ;;  %v2434_v1 = vld [vmem:[#allocation14 + $0x68] sm:$0xff]  }
 0x397   : > { %v1187_v14 = vmax.f32 %v1181_v10, 0.0 }
 0x398   : > { %v1188_v16 = vmax.f32 %v1183_v12, 0.0 }
 0x399   : > { %v1189_v17 = vpack.c.bf16 %v1187_v14, %v1185_v13  ;;  %v2435_v14 = vld [vmem:[#allocation14 + $0x28] sm:$0xff]  }
 0x39a   : > { %v1190_v18 = vpack.c.bf16 %v1188_v16, %v1186_v15  ;;  %v2436_v15 = vld [vmem:[#allocation14 + $0x70] sm:$0xff]  }
 0x39b   : > { %v2437_v16 = vld [vmem:[#allocation14 + $0x30] sm:$0xff]  }
 0x39c   : > { %1358 = vmatprep.mubr.bf16.mxu1 %v1190_v18  ;;  %v2439_v18 = vld [vmem:[#allocation14 + $0x38] sm:$0xff]  }
 0x39d   : > { %1359 = vmatmul.mubr.bf16.vlgmr.msra.gmra.mrb[4].mxu1 %v1189_v17  ;;  %v2438_v17 = vld [vmem:[#allocation14 + $0x78] sm:$0xff]  }
 0x39e   : > { %2126 = vmatpush3.bf16.msra.mxu1 %v2425_v55 }
 0x39f   : > { %2127 = vmatprep.subr.bf16.mxu1 %v2426_v56 }
 0x3a2   : > { %2128 = vmatpush3.bf16.msra.mxu1 %v2427_v57 }
 0x3a3   : > { %2129 = vmatprep.subr.bf16.mxu1 %v2428_v58 }
 0x3a6   : > { %2130 = vmatpush3.bf16.msra.mxu1 %v2429_v59 }
 0x3a7   : > { %2131 = vmatprep.subr.bf16.mxu1 %v2430_v60 }
 0x3aa   : > { %2132 = vmatpush3.bf16.msra.mxu1 %v2431_v61 }
 0x3ab   : > { %2133 = vmatprep.subr.bf16.mxu1 %v2432_v62 }
 0x3ae   : > { %2134 = vmatpush3.bf16.msra.mxu1 %v2433_v63 }
 0x3af   : > { %2135 = vmatprep.subr.bf16.mxu1 %v2434_v1 }
 0x3b2   : > { %2136 = vmatpush3.bf16.msra.mxu1 %v2435_v14 }
 0x3b3   : > { %2137 = vmatprep.subr.bf16.mxu1 %v2436_v15 }
 0x3b6   : > { %2138 = vmatpush3.bf16.msra.mxu1 %v2437_v16 }
 0x3b7   : > { %2139 = vmatprep.subr.bf16.mxu1 %v2438_v17 }
 0x3ba   : > { %2140 = vmatpush3.bf16.msra.mxu1 %v2439_v18 }
 0x470   : > { %v2119_v19 = vpop.f32.mrb[4].mxu1 }
 0x471   : > { %v2120_v20 = vpop.f32.mrb[5].mxu1 }
 0x472   : > { %v2121_v22 = vadd.f32 %v2120_v20, %v2119_v19  ;;  %v2122_v23 = vpop.f32.mrb[6].mxu1  ;;  %v1594_v19 = vld [vmem:[%s3323_s8] sm:$0x3]  ;;  %s2674_s8 = scalar_lea.vmem %s3215_s13, 256 }
 0x473   : > { %v2123_v24 = vpop.f32.mrb[7].mxu1  ;;  %v1599_v20 = vrot.slane %v1594_v19, %v3166_v5  ;;  %p2675_p12 = scmp.ne.s32.totalorder %s3215_s13, %s2674_s8  ;;  %p2682_p8 = scmp.lt.s32.totalorder %s2680_s17, %s2674_s8 }
 0x474   : > { %v2124_v25 = vadd.f32 %v2123_v24, %v2122_v23  ;;  %v1361_v26 = vadd.f32 %v2121_v22, %v2041_v21 }
 0x475   : > { %p2676_p13 = pnand %p2675_p12, %p3326_p1  ;;  %p2683_p6 = por %p2682_p8, %p2681_p2 }
 0x476   : > { %1367 = vmax.xlane.f32.xlu0 %v1361_v26  ;;  %v1364_v27 = vadd.f32 %v2124_v25, %v2041_v21  ;;  %v1603_v21 = vrot.slane %v1594_v19, %v3171_v7  ;;  %v2079_v7 = vld [vmem:[%s3324_s14] ss:$0 sm:$0xff] }
 0x477   : > { %p2677_p0 = pneg %p2676_p13 }
 0x479   : > { %p2684_p10 = pnand %p2683_p6, %p2677_p0 }
 0x47a   : > { %1369 = vmax.xlane.f32.xlu0 %v1364_v27 }
 0x503   : > { %v1368_v38 = vpop.xlane.xlu0 %1367 }
 0x504   : > { %v3201_v39 = vsub.f32 %v1361_v26, %v1368_v38 }
 0x506   : > { %v1373_v40 = vmul.f32 1.442695, %v3201_v39 }
 0x507   : > { %v1370_v41 = vpop.xlane.xlu0 %1369 }
 0x508   : > { %v1372_v42 = vsub.f32 %v1364_v27, %v1370_v41  ;;  %2440 = vpow2.f32 %v1373_v40 }
 0x50a   : > { %v1375_v43 = vmul.f32 1.442695, %v1372_v42 }
 0x50c   : > { %2442 = vpow2.f32 %v1375_v43 }
 0x512   : > { %v2441_v8 = vpop.eup %2440 }
 0x513   : > { %1377 = vadd.xlane.f32.xlu1 %v2441_v8 }
 0x516   : > { %v2443_v44 = vpop.eup %2442 }
 0x517   : > { %1379 = vadd.xlane.f32.xlu1 %v2443_v44 }
 0x5a0   : > { %v1378_v2 = vpop.xlane.xlu1 %1377 }
 0x5a1   : > { %2444 = vlog2.f32 %v1378_v2 }
 0x5a4   : > { %v1380_v3 = vpop.xlane.xlu1 %1379 }
 0x5a5   : > { %2446 = vlog2.f32 %v1380_v3 }
 0x5ab   : > { %v2445_v4 = vpop.eup %2444 }
 0x5ac   : > { %v1382_v6 = vmul.f32 0.6931472, %v2445_v4 }
 0x5ae   : > { %v1385_v11 = vsub.f32 %v3201_v39, %v1382_v6 }
 0x5af   : > { %v2447_v9 = vpop.eup %2446 }
 0x5b0   : > { %v1384_v10 = vmul.f32 0.6931472, %v2447_v9 }
 0x5b2   : > { %v1386_v12 = vsub.f32 %v1372_v42, %v1384_v10 }
 0x5b4   : > { %v1387_v13 = vpack.c.bf16 %v1386_v12, %v1385_v11 }
 0x5b6   : > { %1584 = vmatmul.mubr.bf16.vlgmr.msra.gmra.mrb[8].mxu0 %v1387_v13 }
 0x689   : > { %v1585_v22 = vpop.f32.mrb[8].mxu0 }
 0x68a   : > { %v1606_v23 = vadd.f32 %v1599_v20, %v1585_v22  ;;  %v1587_v24 = vpop.f32.mrb[9].mxu0 }
 0x68b   : > { %v1607_v25 = vadd.f32 %v1603_v21, %v1587_v24  ;;  %v1589_v26 = vpop.f32.mrb[10].mxu0 }
 0x68c   : > { %v1608_v27 = vadd.f32 %v1599_v20, %v1589_v26  ;;  %v1591_v28 = vpop.f32.mrb[11].mxu0  ;;  %v1610_v30 = vmax.f32 %v1606_v23, 0.0 }
 0x68d   : > { %v1609_v29 = vadd.f32 %v1603_v21, %v1591_v28  ;;  %v1611_v32 = vmax.f32 %v1607_v25, 0.0 }
 0x68e   : > { %v1612_v31 = vmax.f32 %v1608_v27, 0.0 }
 0x68f   : > { %v1613_v33 = vmax.f32 %v1609_v29, 0.0 }
 0x690   : > { %v1614_v34 = vpack.c.bf16 %v1612_v31, %v1610_v30 }
 0x691   : > { %v1615_v35 = vpack.c.bf16 %v1613_v33, %v1611_v32 }
 0x693   : > { %1783 = vmatprep.mubr.bf16.mxu1 %v1615_v35 }
 0x694   : > { %1784 = vmatmul.mubr.bf16.vlgmr.msra.gmra.mrb[8].mxu1 %v1614_v34 }
 0x767   : > { %v2141_v5 = vpop.f32.mrb[8].mxu1 }
 0x768   : > { %v2142_v36 = vpop.f32.mrb[9].mxu1 }
 0x769   : > { %v2143_v37 = vadd.f32 %v2142_v36, %v2141_v5  ;;  %v2144_v38 = vpop.f32.mrb[10].mxu1 }
 0x76a   : > { %v2145_v39 = vpop.f32.mrb[11].mxu1 }
 0x76b   : > { %v1786_v40 = vadd.f32 %v2143_v37, %v2079_v7  ;;  %v2146_v41 = vadd.f32 %v2145_v39, %v2144_v38 }
 0x76d   : > { %1792 = vst [vmem:[%s585_s22] sm:$0xff] %v1786_v40  ;;  %v1789_v42 = vadd.f32 %v2146_v41, %v2079_v7 }
 0x76f   : > { %1793 = vst [vmem:[%s585_s22 + $0x8] sm:$0xff] %v1789_v42 }
 0x770   : > { %2687 = shalt.err (!%p2684_p10)
}
 0x771   : > { %s2688_s24 = scalar_lea.hbm %s3220_s5, 256  ;;  %s2692_s10 = scalar_lea.hbm %s3325_s26, 512 }
 0x772   : > { %p2689_p11 = scmp.ne.s32.totalorder %s3220_s5, %s2688_s24  ;;  %p2693_p9 = scmp.lt.u32.totalorder %s3220_s5, %s3325_s26 }
 0x773   : > { %p2694_p7 = scmp.lt.u32.totalorder %s2692_s10, %s2688_s24  ;;  %p2696_p12 = scmp.lt.u32.totalorder %s2688_s24, %s3220_s5 }
 0x774   : > { %p2690_p3 = pnand %p2689_p11, %p3326_p1 }
 0x775   : > { %p2695_p4 = por %p2694_p7, %p2693_p9 }
 0x776   : > { %p2691_p5 = pneg %p2690_p3 }
 0x777   : > { %p2697_p13 = por %p2696_p12, %p2695_p4 }
 0x779   : > { %p2698_p0 = pnand %p2697_p13, %p2691_p5 }
 0x77b   : > { %2701 = shalt.err (!%p2698_p0)
}
 0x77c   : > { %s2772_s8 = smov 128   ;;  %s2773_s19 = smov 8  }
 0x77d   : > { %2181 = dma.vmem_to_hbm [thread:$0]  (%p3326_p1), %s3215_s13, 256, %s3220_s5, %s1795_s27, %s2772_s8, %s2772_s8, %s2773_s19  }
 0x77e PF: > { %s1823_s23 = sand.u32 1, %s2744_s29   ;;  %p3327_p2 = scmp.ne.s32.totalorder %s3309_s28, 0 }
 0x77f   : > { %p3328_p8 = scmp.ge.s32.totalorder %s2756_s16, 2  ;;  %s1824_s17 = scalar_lea.sflag [#allocation4], %s1823_s23 }
 0x781   : > { %p2210_p6 = pnand %p3328_p8, %p3327_p2 }
 0x783   : > { %2739 = dma.done.wait (!%p2210_p6), %s1824_s17, 256  }
 0x784   : > { %2741 = vsyncadd (!%p2210_p6), %s1824_s17, 4294967040  ;;  %p31_p10 = scmp.ge.s32.totalorder %s3061_s21, 4   ;;  %s3329_s29 = smov %s2748_s30 }
 0x785   : > { %s3330_s30 = smov %s2752_s15  ;;  %s3331_s15 = smov %s3073_s1 }
 0x786   : > { %s3332_s16 = smov %s3061_s21  ;;  %33 = sbr.rel (!%p31_p10) target bundleno = 18 (0x12), region = 149 }
 0x78d   :  { %1829 = vsyncpa [#allocation3], 1 }
 0x78e   :  { %1831 = vsyncpa [#allocation3 + $0x1], 1 }
 0x78f   :  { %1832 = vsyncpa [#allocation6], 1 }
 0x790   :  { %1833 = vsyncpa [#allocation9], 1 }
 0x791   :  { %1834 = vsyncpa [#allocation12], 1 }
 0x792   :  { %1835 = vsyncpa [#allocation15], 1 }
 0x793   :  { %1836 = vsyncpa [#allocation4], 1 }
 0x794   :  { %1838 = vsyncpa [#allocation4 + $0x1], 1 }

</bundles_post_ra>
